<compile_context>
chip_gen: v6e
topology: v6e:2x2x1
jax: 0.10.0
libtpu: 0.0.40
codegen_flags: <defaults>
</compile_context>

<pallas_src>
import functools

import jax
import jax.numpy as jnp
from jax import lax
from jax.experimental import pallas as pl
from jax.experimental.pallas import tpu as pltpu


# ------------------------- wrapper-side weight prep ------------------------- #

def _banded_weights(w_hwio, width):
    """(3, 3, Cin, Cout) -> (3*W*Cin, W*Cout) concatenated band matrix.

    Activation rows are laid out as
        A[row, dy*W*Cin + a*Cin + ci] = x[h+dy-1, a, ci]   (0 outside the image)
    so the 3x3 "SAME" conv is the single matmul  A @ B  with
        B[dy*W*Cin + a*Cin + ci, x*Cout + co] = w[dy, a+1-x, ci, co]
    whenever 0 <= a+1-x < 3, else 0 (the band also encodes the zero padding).
    """
    kh, kw, cin, cout = w_hwio.shape
    a = jnp.arange(width)
    x = jnp.arange(width)
    dx = jnp.arange(kw)
    # ind[d, a, x] = 1 iff a + 1 - x == d
    ind = ((a[None, :, None] - x[None, None, :] + 1) == dx[:, None, None]).astype(
        w_hwio.dtype)
    b5 = jnp.einsum("ydio,dax->yaixo", w_hwio, ind)   # (kh, W, Cin, W, Cout)
    return b5.reshape(kh * width * cin, width * cout)


def _group_mean_matrix(width, cout, count):
    """G[l, l'] = [l % Cout == l' % Cout] / count  (shape (W*Cout, W*Cout)).

    stats_row @ G = per-channel mean broadcast back to every lane of that
    channel (one MXU op does the strided reduce + broadcast)."""
    lane = jnp.arange(width * cout)
    same = (lane[:, None] % cout) == (lane[None, :] % cout)
    return same.astype(jnp.float32) / jnp.float32(count)


# --------------------------------- kernel ----------------------------------- #

def _make_kernel(N, H, W, cin, cout, eps):
    WC = W * cout
    WCIN = W * cin

    def kernel(x_ref, wb_ref, g_ref, gb_ref, o_ref, a_ref, stat_ref):
        # ---- build the im2row ("concat-K") activation matrix in VMEM --------
        # Zero fill provides the conv zero padding (top/bottom rows and the
        # dx band edges are already folded into the banded weights).
        a_ref[...] = jnp.zeros_like(a_ref)
        for n in range(N):                     # static unroll, N is tiny
            r0 = n * H
            xn = x_ref[n]                      # (H, W*Cin) bf16
            # dy = 0 taps: output row h sees input row h-1
            a_ref[r0 + 1:r0 + H, 0:WCIN] = xn[0:H - 1, :]
            # dy = 1 taps: output row h sees input row h
            a_ref[r0:r0 + H, WCIN:2 * WCIN] = xn
            # dy = 2 taps: output row h sees input row h+1
            a_ref[r0:r0 + H - 1, 2 * WCIN:3 * WCIN] = xn[1:H, :]

        # ---- conv: ONE MXU matmul, M=N*H, K=3*W*Cin, lane-dense W*Cout ------
        y = jnp.dot(a_ref[...], wb_ref[...],
                    preferred_element_type=jnp.float32)          # (N*H, WC) f32

        # ---- train-mode batch statistics (f32 throughout) -------------------
        stat_ref[0:1, :] = jnp.sum(y, axis=0, keepdims=True)      # per-lane sum
        stat_ref[1:2, :] = jnp.sum(y * y, axis=0, keepdims=True)  # per-lane sumsq
        # per-channel reduce + broadcast-back in one small f32 matmul
        m = jnp.dot(stat_ref[...], g_ref[...],
                    preferred_element_type=jnp.float32)           # (2, WC)
        mean = m[0:1, :]
        var = m[1:2, :] - mean * mean          # biased, as PyTorch uses in training
        scale = gb_ref[0:1, :] * lax.rsqrt(var + jnp.float32(eps))   # EUP rsqrt
        shift = gb_ref[1:2, :] - mean * scale

        # ---- BN + ReLU, unmasked 128-lane stores -----------------------------
        o_ref[...] = jnp.maximum(y * scale + shift, 0.0)

    return kernel


# -------------------------------- forward ----------------------------------- #

@functools.partial(jax.jit, static_argnames=("eps",))
def single_conv_forward(params, x_nchw, eps=1e-5):
    """Pallas forward of single_conv. Input/output are NCHW like the PyTorch module."""
    n_batch, cin, H, W = x_nchw.shape
    w = params["w"]
    cout = w.shape[-1]
    WC = W * cout

    # NCHW -> lane-dense (N, H, W*Cin), bf16 (MXU operand dtype; halves x DMA).
    # Boundary transposes kept only because the public interface is NCHW.
    x2d = jnp.transpose(x_nchw, (0, 2, 3, 1)).reshape(n_batch, H, W * cin)
    x2d = x2d.astype(jnp.bfloat16)
    wb = _banded_weights(w.astype(jnp.float32), W).astype(jnp.bfloat16)
    g = _group_mean_matrix(W, cout, n_batch * H * W)
    gb = jnp.stack(
        [jnp.tile(params["gamma"].astype(jnp.float32), W),
         jnp.tile(params["beta"].astype(jnp.float32), W)], axis=0)    # (2, WC)
    # NOTE: params["b"] (conv bias) is intentionally unused: it cancels exactly
    # under train-mode BatchNorm (verified against the reference below).

    # VMEM budget: double-buffered operands + output + scratch, with headroom.
    nbytes = lambda a: a.size * a.dtype.itemsize
    vmem_bytes = (2 * (nbytes(x2d) + nbytes(wb) + nbytes(g) + nbytes(gb))
                  + 2 * (n_batch * H * WC * 4)
                  + (n_batch * H) * (3 * W * cin) * 2 + 2 * WC * 4)
    vmem_limit = max(4 * vmem_bytes, 4 * 1024 * 1024)

    kernel = _make_kernel(n_batch, H, W, cin, cout, eps)
    out2d = pl.pallas_call(
        kernel,
        out_shape=jax.ShapeDtypeStruct((n_batch * H, WC), jnp.float32),
        grid=(1,),                         # single step: whole batch at once
        in_specs=[
            pl.BlockSpec((n_batch, H, W * cin), lambda i: (0, 0, 0)),
            pl.BlockSpec((3 * W * cin, WC), lambda i: (0, 0)),
            pl.BlockSpec((WC, WC), lambda i: (0, 0)),
            pl.BlockSpec((2, WC), lambda i: (0, 0)),
        ],
        out_specs=pl.BlockSpec((n_batch * H, WC), lambda i: (0, 0)),
        scratch_shapes=[
            pltpu.VMEM((n_batch * H, 3 * W * cin), jnp.bfloat16),  # im2row matrix
            pltpu.VMEM((2, WC), jnp.float32),                      # sum / sumsq
        ],
        compiler_params=pltpu.CompilerParams(
            dimension_semantics=("arbitrary",),
            vmem_limit_bytes=int(vmem_limit)),
    )(x2d, wb, g, gb)

    return jnp.transpose(out2d.reshape(n_batch, H, W, cout), (0, 3, 1, 2))


# ------------------------------- reference ---------------------------------- #

def reference_forward(params, x_nchw, eps=1e-5):
    """Pure-JAX f32 reference faithful to the PyTorch module (includes conv bias)."""
    x = jnp.transpose(x_nchw, (0, 2, 3, 1)).astype(jnp.float32)
    y = lax.conv_general_dilated(
        x, params["w"].astype(jnp.float32), (1, 1), "SAME",
        dimension_numbers=("NHWC", "HWIO", "NHWC"),
        precision=lax.Precision.HIGHEST) + params["b"]
    mean = jnp.mean(y, axis=(0, 1, 2))
    var = jnp.var(y, axis=(0, 1, 2))        # biased, as PyTorch uses in training mode
    scale = params["gamma"] / jnp.sqrt(var + eps)
    shift = params["beta"] - mean * scale
    y = jnp.maximum(y * scale + shift, 0.0)
    return jnp.transpose(y, (0, 3, 1, 2))


def init_params(key, ch_in, ch_out):
    k1, k2 = jax.random.split(key)
    return {
        # HWIO weights (PyTorch stores OIHW; transposed layout here)
        "w": jax.random.normal(k1, (3, 3, ch_in, ch_out), jnp.float32) * 0.1,
        "b": jax.random.normal(k2, (ch_out,), jnp.float32) * 0.1,
        "gamma": jnp.ones((ch_out,), jnp.float32),   # fresh BatchNorm2d init
        "beta": jnp.zeros((ch_out,), jnp.float32),
    }


if __name__ == "__main__":
    key = jax.random.PRNGKey(0)
    kx, kp = jax.random.split(key)

    N, ch_in, ch_out, H, W = 2, 4, 8, 16, 16    # W * ch_out = 128 -> lane-dense output
    x = jax.random.normal(kx, (N, ch_in, H, W), jnp.float32)   # NCHW like PyTorch
    params = init_params(kp, ch_in, ch_out)

    out = jax.block_until_ready(single_conv_forward(params, x))
    ref = reference_forward(params, x)

    assert out.shape == (N, ch_out, H, W)
    # bf16 MXU operands vs strict-f32 reference -> ~1e-2 tolerance.
    assert jnp.allclose(out, ref, atol=1e-2, rtol=1e-2), \
        float(jnp.max(jnp.abs(out - ref)))

    print("KERNEL_OK")
</pallas_src>

<mosaic_0001>
module attributes {stable_mosaic.version = 11 : i64} {
  func.func @kernel(%arg0: i32, %arg1: memref<2x16x64xbf16, #tpu.memory_space<vmem>>, %arg2: memref<192x128xbf16, #tpu.memory_space<vmem>>, %arg3: memref<128x128xf32, #tpu.memory_space<vmem>>, %arg4: memref<2x128xf32, #tpu.memory_space<vmem>>, %arg5: memref<32x128xf32, #tpu.memory_space<vmem>>, %arg6: memref<32x192xbf16, #tpu.memory_space<vmem>>, %arg7: memref<2x128xf32, #tpu.memory_space<vmem>>) attributes {dimension_semantics = [#tpu.dimension_semantics<arbitrary>], iteration_bounds = array<i64: 1>, scalar_prefetch = 0 : i64, scratch_operands = 2 : i64, tpu.core_type = #tpu.core_type<tc>, window_params = [{pipeline_mode = #tpu.pipeline_mode<synchronous>, transform_indices = @transform_0, window_bounds = array<i64: 2, 16, 64>}, {pipeline_mode = #tpu.pipeline_mode<synchronous>, transform_indices = @transform_1, window_bounds = array<i64: 192, 128>}, {pipeline_mode = #tpu.pipeline_mode<synchronous>, transform_indices = @transform_2, window_bounds = array<i64: 128, 128>}, {pipeline_mode = #tpu.pipeline_mode<synchronous>, transform_indices = @transform_3, window_bounds = array<i64: 2, 128>}, {pipeline_mode = #tpu.pipeline_mode<synchronous>, transform_indices = @transform_4, window_bounds = array<i64: 32, 128>}]} {
    %cst = arith.constant 0.000000e+00 : bf16
    %0 = vector.broadcast %cst : bf16 to vector<32x192xbf16>
    %c0 = arith.constant 0 : index
    %c0_0 = arith.constant 0 : index
    %1 = vector.load %arg6[%c0, %c0_0] : memref<32x192xbf16, #tpu.memory_space<vmem>>, vector<32x192xbf16>
    tpu.vector_store %arg6[%c0, %c0_0], %0 {strides = array<i32>} : memref<32x192xbf16, #tpu.memory_space<vmem>>, vector<32x192xbf16>,
    %c0_1 = arith.constant 0 : index
    %c0_2 = arith.constant 0 : index
    %c0_3 = arith.constant 0 : index
    %2 = vector.load %arg1[%c0_1, %c0_2, %c0_3] : memref<2x16x64xbf16, #tpu.memory_space<vmem>>, vector<1x16x64xbf16>
    %3 = vector.shape_cast %2 : vector<1x16x64xbf16> to vector<16x64xbf16>
    %4 = vector.extract_strided_slice %3 {offsets = [0, 0], sizes = [15, 64], strides = [1, 1]} : vector<16x64xbf16> to vector<15x64xbf16>
    %c1 = arith.constant 1 : index
    %c0_4 = arith.constant 0 : index
    %5 = vector.load %arg6[%c1, %c0_4] : memref<32x192xbf16, #tpu.memory_space<vmem>>, vector<15x64xbf16>
    tpu.vector_store %arg6[%c1, %c0_4], %4 {strides = array<i32>} : memref<32x192xbf16, #tpu.memory_space<vmem>>, vector<15x64xbf16>,
    %c0_5 = arith.constant 0 : index
    %c64 = arith.constant 64 : index
    %6 = vector.load %arg6[%c0_5, %c64] : memref<32x192xbf16, #tpu.memory_space<vmem>>, vector<16x64xbf16>
    tpu.vector_store %arg6[%c0_5, %c64], %3 {strides = array<i32>} : memref<32x192xbf16, #tpu.memory_space<vmem>>, vector<16x64xbf16>,
    %7 = vector.extract_strided_slice %3 {offsets = [1, 0], sizes = [15, 64], strides = [1, 1]} : vector<16x64xbf16> to vector<15x64xbf16>
    %c0_6 = arith.constant 0 : index
    %c128 = arith.constant 128 : index
    %8 = vector.load %arg6[%c0_6, %c128] : memref<32x192xbf16, #tpu.memory_space<vmem>>, vector<15x64xbf16>
    tpu.vector_store %arg6[%c0_6, %c128], %7 {strides = array<i32>} : memref<32x192xbf16, #tpu.memory_space<vmem>>, vector<15x64xbf16>,
    %c1_7 = arith.constant 1 : index
    %c0_8 = arith.constant 0 : index
    %c0_9 = arith.constant 0 : index
    %9 = vector.load %arg1[%c1_7, %c0_8, %c0_9] : memref<2x16x64xbf16, #tpu.memory_space<vmem>>, vector<1x16x64xbf16>
    %10 = vector.shape_cast %9 : vector<1x16x64xbf16> to vector<16x64xbf16>
    %11 = vector.extract_strided_slice %10 {offsets = [0, 0], sizes = [15, 64], strides = [1, 1]} : vector<16x64xbf16> to vector<15x64xbf16>
    %c17 = arith.constant 17 : index
    %c0_10 = arith.constant 0 : index
    %12 = vector.load %arg6[%c17, %c0_10] : memref<32x192xbf16, #tpu.memory_space<vmem>>, vector<15x64xbf16>
    tpu.vector_store %arg6[%c17, %c0_10], %11 {strides = array<i32>} : memref<32x192xbf16, #tpu.memory_space<vmem>>, vector<15x64xbf16>,
    %c16 = arith.constant 16 : index
    %c64_11 = arith.constant 64 : index
    %13 = vector.load %arg6[%c16, %c64_11] : memref<32x192xbf16, #tpu.memory_space<vmem>>, vector<16x64xbf16>
    tpu.vector_store %arg6[%c16, %c64_11], %10 {strides = array<i32>} : memref<32x192xbf16, #tpu.memory_space<vmem>>, vector<16x64xbf16>,
    %14 = vector.extract_strided_slice %10 {offsets = [1, 0], sizes = [15, 64], strides = [1, 1]} : vector<16x64xbf16> to vector<15x64xbf16>
    %c16_12 = arith.constant 16 : index
    %c128_13 = arith.constant 128 : index
    %15 = vector.load %arg6[%c16_12, %c128_13] : memref<32x192xbf16, #tpu.memory_space<vmem>>, vector<15x64xbf16>
    tpu.vector_store %arg6[%c16_12, %c128_13], %14 {strides = array<i32>} : memref<32x192xbf16, #tpu.memory_space<vmem>>, vector<15x64xbf16>,
    %c0_14 = arith.constant 0 : index
    %c0_15 = arith.constant 0 : index
    %16 = vector.load %arg6[%c0_14, %c0_15] : memref<32x192xbf16, #tpu.memory_space<vmem>>, vector<32x192xbf16>
    %c0_16 = arith.constant 0 : index
    %c0_17 = arith.constant 0 : index
    %17 = vector.load %arg2[%c0_16, %c0_17] : memref<192x128xbf16, #tpu.memory_space<vmem>>, vector<192x128xbf16>
    %cst_18 = arith.constant dense<0.000000e+00> : vector<32x128xf32>
    %18 = tpu.matmul %16, %17, %cst_18 {dimension_numbers = #tpu.dot_dimension_numbers<[1], [0], [0], [1], [0, 0, 1, 1], [], []>} : vector<32x192xbf16>, vector<192x128xbf16>, vector<32x128xf32> -> vector<32x128xf32>
    %cst_19 = arith.constant dense<0.000000e+00> : vector<128xf32>
    %19 = vector.multi_reduction <add>, %18, %cst_19 [0] : vector<32x128xf32> to vector<128xf32>
    %20 = vector.shape_cast %19 : vector<128xf32> to vector<1x128xf32>
    %c0_20 = arith.constant 0 : index
    %c0_21 = arith.constant 0 : index
    %21 = vector.load %arg7[%c0_20, %c0_21] : memref<2x128xf32, #tpu.memory_space<vmem>>, vector<1x128xf32>
    tpu.vector_store %arg7[%c0_20, %c0_21], %20 {strides = array<i32>} : memref<2x128xf32, #tpu.memory_space<vmem>>, vector<1x128xf32>,
    %22 = arith.mulf %18, %18 : vector<32x128xf32>
    %cst_22 = arith.constant dense<0.000000e+00> : vector<128xf32>
    %23 = vector.multi_reduction <add>, %22, %cst_22 [0] : vector<32x128xf32> to vector<128xf32>
    %24 = vector.shape_cast %23 : vector<128xf32> to vector<1x128xf32>
    %c1_23 = arith.constant 1 : index
    %c0_24 = arith.constant 0 : index
    %25 = vector.load %arg7[%c1_23, %c0_24] : memref<2x128xf32, #tpu.memory_space<vmem>>, vector<1x128xf32>
    tpu.vector_store %arg7[%c1_23, %c0_24], %24 {strides = array<i32>} : memref<2x128xf32, #tpu.memory_space<vmem>>, vector<1x128xf32>,
    %c0_25 = arith.constant 0 : index
    %c0_26 = arith.constant 0 : index
    %26 = vector.load %arg7[%c0_25, %c0_26] : memref<2x128xf32, #tpu.memory_space<vmem>>, vector<2x128xf32>
    %c0_27 = arith.constant 0 : index
    %c0_28 = arith.constant 0 : index
    %27 = vector.load %arg3[%c0_27, %c0_28] : memref<128x128xf32, #tpu.memory_space<vmem>>, vector<128x128xf32>
    %cst_29 = arith.constant dense<0.000000e+00> : vector<2x128xf32>
    %28 = tpu.matmul %26, %27, %cst_29 {dimension_numbers = #tpu.dot_dimension_numbers<[1], [0], [0], [1], [0, 0, 1, 1], [], []>} : vector<2x128xf32>, vector<128x128xf32>, vector<2x128xf32> -> vector<2x128xf32>
    %29 = vector.extract_strided_slice %28 {offsets = [0, 0], sizes = [1, 128], strides = [1, 1]} : vector<2x128xf32> to vector<1x128xf32>
    %30 = vector.extract_strided_slice %28 {offsets = [1, 0], sizes = [1, 128], strides = [1, 1]} : vector<2x128xf32> to vector<1x128xf32>
    %31 = arith.mulf %29, %29 : vector<1x128xf32>
    %32 = arith.subf %30, %31 : vector<1x128xf32>
    %c0_30 = arith.constant 0 : index
    %c0_31 = arith.constant 0 : index
    %33 = vector.load %arg4[%c0_30, %c0_31] : memref<2x128xf32, #tpu.memory_space<vmem>>, vector<1x128xf32>
    %cst_32 = arith.constant 9.99999974E-6 : f32
    %34 = vector.broadcast %cst_32 : f32 to vector<1x128xf32>
    %35 = arith.addf %32, %34 : vector<1x128xf32>
    %36 = math.rsqrt %35 : vector<1x128xf32>
    %37 = arith.mulf %33, %36 : vector<1x128xf32>
    %c1_33 = arith.constant 1 : index
    %c0_34 = arith.constant 0 : index
    %38 = vector.load %arg4[%c1_33, %c0_34] : memref<2x128xf32, #tpu.memory_space<vmem>>, vector<1x128xf32>
    %39 = arith.mulf %29, %37 : vector<1x128xf32>
    %40 = arith.subf %38, %39 : vector<1x128xf32>
    %41 = vector.broadcast %37 : vector<1x128xf32> to vector<32x128xf32>
    %42 = arith.mulf %18, %41 : vector<32x128xf32>
    %43 = vector.broadcast %40 : vector<1x128xf32> to vector<32x128xf32>
    %44 = arith.addf %42, %43 : vector<32x128xf32>
    %cst_35 = arith.constant 0.000000e+00 : f32
    %45 = vector.broadcast %cst_35 : f32 to vector<32x128xf32>
    %46 = arith.maximumf %44, %45 : vector<32x128xf32>
    %c0_36 = arith.constant 0 : index
    %c0_37 = arith.constant 0 : index
    %47 = vector.load %arg5[%c0_36, %c0_37] : memref<32x128xf32, #tpu.memory_space<vmem>>, vector<32x128xf32>
    tpu.vector_store %arg5[%c0_36, %c0_37], %46 {strides = array<i32>} : memref<32x128xf32, #tpu.memory_space<vmem>>, vector<32x128xf32>,
    return
  }
  func.func @transform_0(%arg0: i32) -> (i32, i32, i32) {
    %c0_i32 = arith.constant 0 : i32
    %c0_i32_0 = arith.constant 0 : i32
    %c0_i32_1 = arith.constant 0 : i32
    %c0_i32_2 = arith.constant 0 : i32
    return %c0_i32, %c0_i32_0, %c0_i32_1 : i32, i32, i32
  }
  func.func @transform_1(%arg0: i32) -> (i32, i32) {
    %c0_i32 = arith.constant 0 : i32
    %c0_i32_0 = arith.constant 0 : i32
    %c0_i32_1 = arith.constant 0 : i32
    return %c0_i32, %c0_i32_0 : i32, i32
  }
  func.func @transform_2(%arg0: i32) -> (i32, i32) {
    %c0_i32 = arith.constant 0 : i32
    %c0_i32_0 = arith.constant 0 : i32
    %c0_i32_1 = arith.constant 0 : i32
    return %c0_i32, %c0_i32_0 : i32, i32
  }
  func.func @transform_3(%arg0: i32) -> (i32, i32) {
    %c0_i32 = arith.constant 0 : i32
    %c0_i32_0 = arith.constant 0 : i32
    %c0_i32_1 = arith.constant 0 : i32
    return %c0_i32, %c0_i32_0 : i32, i32
  }
  func.func @transform_4(%arg0: i32) -> (i32, i32) {
    %c0_i32 = arith.constant 0 : i32
    %c0_i32_0 = arith.constant 0 : i32
    %c0_i32_1 = arith.constant 0 : i32
    return %c0_i32, %c0_i32_0 : i32, i32
  }
}

</mosaic_0001>

<bundles_post_ra>
// kernel: tile.13
= control target key start
LH: loop header
LB: loop body
LE: loop exit
PB: predicated region body
PF: predicated region fallthrough
CT: control target
= control target key end

     0   :  { %s28_s0 = inlined_call_operand.vmem [shape: f32[8], index: 0, kind: input, shape index: {}]   ;;  %s29_s1 = inlined_call_operand.vmem [shape: f32[16,8], index: 1, kind: output, shape index: {}]  }
   0x1   :  { %v4_v0 = vld [vmem:[%s28_s0] ss:$0 sm:$0xff] }
   0x2   :  { %5 = vst [vmem:[%s29_s1] sm:$0xff] %v4_v0  ;;  %8 = vst [vmem:[%s29_s1 + $0x8] sm:$0xff] %v4_v0 }

// kernel: tile.18
= control target key start
LH: loop header
LB: loop body
LE: loop exit
PB: predicated region body
PF: predicated region fallthrough
CT: control target
= control target key end

     0   :  { %s133_s10 = smov 120   ;;  %s134_s11 = smov 104   ;;  %vm3_vm0 = vcmask 64512   ;;  %vm9_vm1 = vcmask 1048512   ;;  %vm15_vm2 = vcmask 982912   ;;  %vm21_vm3 = vcmask 917312   ;;  %s209_s0 = inlined_call_operand.vmem [shape: f32[16,8], index: 0, kind: input, shape index: {}]   ;;  %s210_s1 = inlined_call_operand.vmem [shape: f32[1,128], index: 1, kind: output, shape index: {}]  }
   0x1   :  { %v103_v0 = vld [vmem:[%s209_s0 + $0xf] sm:$0x1]   ;;  %v105_v1 = vld [vmem:[%s209_s0 + $0xd] sm:$0x1]   ;;  %v104_v2 = vld [vmem:[%s209_s0 + $0xe] sm:$0x1]  }
   0x2   :  { %7 = vrot.lane.b32.xlu0 %v103_v0, %s133_s10  ;;  %19 = vrot.lane.b32.xlu1 %v105_v1, %s134_s11  ;;  %v106_v3 = vld [vmem:[%s209_s0 + $0xc] sm:$0x1]   ;;  %s135_s16 = smov 112   ;;  %s136_s17 = smov 96   ;;  %v107_v4 = vld [vmem:[%s209_s0 + $0xb] sm:$0x1]  }
   0x3   :  { %v108_v5 = vld [vmem:[%s209_s0 + $0xa] sm:$0x1]   ;;  %v2_v6 = vld [vmem:[%s209_s0] sm:$0x1]   ;;  %s137_s24 = smov 88   ;;  %s138_s25 = smov 80  }
   0x4   :  { %4 = vst.msk [vmem:[#allocation0] sm:$0x1] %vm3_vm0, %v2_v6   ;;  %v109_v7 = vld [vmem:[%s209_s0 + $0x9] sm:$0x1]   ;;  %v110_v8 = vld [vmem:[%s209_s0 + $0x8] sm:$0x1]  }
   0x5   :  { %s139_s30 = smov 72   ;;  %s140_s2 = smov 64   ;;  %v111_v9 = vld [vmem:[%s209_s0 + $0x7] sm:$0x1]   ;;  %v112_v10 = vld [vmem:[%s209_s0 + $0x6] sm:$0x1]  }
   0x6   :  { %13 = vrot.lane.b32.xlu0 %v104_v2, %s135_s16  ;;  %25 = vrot.lane.b32.xlu1 %v106_v3, %s136_s17  ;;  %s141_s7 = smov 56   ;;  %s142_s8 = smov 48   ;;  %v113_v11 = vld [vmem:[%s209_s0 + $0x5] sm:$0x1]   ;;  %v114_v12 = vld [vmem:[%s209_s0 + $0x4] sm:$0x1]  }
   0x7   :  { %s143_s13 = smov 40   ;;  %s144_s14 = smov 32   ;;  %v115_v13 = vld [vmem:[%s209_s0 + $0x3] sm:$0x1]   ;;  %v116_v14 = vld [vmem:[%s209_s0 + $0x2] sm:$0x1]  }
   0x8   :  { %s145_s19 = smov 24   ;;  %s146_s20 = smov 16   ;;  %v117_v15 = vld [vmem:[%s209_s0 + $0x1] sm:$0x1]   ;;  %vm27_vm4 = vcmask 851712   ;;  %vm33_vm5 = vcmask 786112  }
   0x9   :  { %s147_s0 = smov 8   ;;  %vm39_vm6 = vcmask 720512   ;;  %vm45_vm7 = vcmask 654912   ;;  %vm51_vm8 = vcmask 589312   ;;  %vm57_vm9 = vcmask 523712  }
   0xa   :  { %31 = vrot.lane.b32.xlu0 %v107_v4, %s137_s24  ;;  %37 = vrot.lane.b32.xlu1 %v108_v5, %s138_s25  ;;  %vm63_vm10 = vcmask 458112   ;;  %vm69_vm11 = vcmask 392512   ;;  %vm75_vm12 = vcmask 326912   ;;  %vm81_vm13 = vcmask 261312  }
   0xb   :  { %vm87_vm14 = vcmask 195712   ;;  %vm93_vm15 = vcmask 130112  }
   0xe   :  { %43 = vrot.lane.b32.xlu0 %v109_v7, %s139_s30  ;;  %49 = vrot.lane.b32.xlu1 %v110_v8, %s140_s2 }
  0x12   :  { %55 = vrot.lane.b32.xlu0 %v111_v9, %s141_s7  ;;  %61 = vrot.lane.b32.xlu1 %v112_v10, %s142_s8 }
  0x16   :  { %67 = vrot.lane.b32.xlu0 %v113_v11, %s143_s13  ;;  %73 = vrot.lane.b32.xlu1 %v114_v12, %s144_s14 }
  0x1a   :  { %79 = vrot.lane.b32.xlu0 %v115_v13, %s145_s19  ;;  %85 = vrot.lane.b32.xlu1 %v116_v14, %s146_s20 }
  0x1e   :  { %91 = vrot.lane.b32.xlu0 %v117_v15, %s147_s0 }
  0x74   :  { %v8_v16 = vpop.permute.xlu0 %7   ;;  %v20_v17 = vpop.permute.xlu1 %19  }
  0x75   :  { %10 = vst.msk [vmem:[#allocation0] sm:$0x1] %vm9_vm1, %v8_v16  }
  0x78   :  { %v14_v18 = vpop.permute.xlu0 %13   ;;  %v26_v19 = vpop.permute.xlu1 %25  }
  0x79   :  { %16 = vst.msk [vmem:[#allocation0] sm:$0x1] %vm15_vm2, %v14_v18  }
  0x7a   :  { %22 = vst.msk [vmem:[#allocation0] sm:$0x1] %vm21_vm3, %v20_v17  }
  0x7b   :  { %28 = vst.msk [vmem:[#allocation0] sm:$0x1] %vm27_vm4, %v26_v19  }
  0x7c   :  { %v32_v20 = vpop.permute.xlu0 %31   ;;  %v38_v21 = vpop.permute.xlu1 %37  }
  0x7d   :  { %34 = vst.msk [vmem:[#allocation0] sm:$0x1] %vm33_vm5, %v32_v20  }
  0x7e   :  { %40 = vst.msk [vmem:[#allocation0] sm:$0x1] %vm39_vm6, %v38_v21  }
  0x80   :  { %v44_v22 = vpop.permute.xlu0 %43   ;;  %v50_v23 = vpop.permute.xlu1 %49  }
  0x81   :  { %46 = vst.msk [vmem:[#allocation0] sm:$0x1] %vm45_vm7, %v44_v22  }
  0x82   :  { %52 = vst.msk [vmem:[#allocation0] sm:$0x1] %vm51_vm8, %v50_v23  }
  0x84   :  { %v56_v24 = vpop.permute.xlu0 %55   ;;  %v62_v25 = vpop.permute.xlu1 %61  }
  0x85   :  { %58 = vst.msk [vmem:[#allocation0] sm:$0x1] %vm57_vm9, %v56_v24  }
  0x86   :  { %64 = vst.msk [vmem:[#allocation0] sm:$0x1] %vm63_vm10, %v62_v25  }
  0x88   :  { %v68_v26 = vpop.permute.xlu0 %67   ;;  %v74_v27 = vpop.permute.xlu1 %73  }
  0x89   :  { %70 = vst.msk [vmem:[#allocation0] sm:$0x1] %vm69_vm11, %v68_v26  }
  0x8a   :  { %76 = vst.msk [vmem:[#allocation0] sm:$0x1] %vm75_vm12, %v74_v27  }
  0x8c   :  { %v80_v28 = vpop.permute.xlu0 %79   ;;  %v86_v29 = vpop.permute.xlu1 %85  }
  0x8d   :  { %82 = vst.msk [vmem:[#allocation0] sm:$0x1] %vm81_vm13, %v80_v28  }
  0x8e   :  { %88 = vst.msk [vmem:[#allocation0] sm:$0x1] %vm87_vm14, %v86_v29  }
  0x90   :  { %v92_v30 = vpop.permute.xlu0 %91  }
  0x91   :  { %94 = vst.msk [vmem:[#allocation0] sm:$0x1] %vm93_vm15, %v92_v30  }
  0x98   :  { %v99_v31 = vld [vmem:[#allocation0] sm:$0x1] }
  0x99   :  { %102 = vst [vmem:[%s210_s1] sm:$0x1] %v99_v31 }

// kernel: single_conv_forward.1
= control target key start
LH: loop header
LB: loop body
LE: loop exit
PB: predicated region body
PF: predicated region fallthrough
CT: control target
= control target key end

     0   :  { %vm67_vm0 = vsmask.f32 3328  ;;  %vm68_vm1 = vsmask.f32 7440  ;;  %v560_v2 = vmov 0   ;;  %s561_s19 = smov 64   ;;  %s754_s0 = inlined_call_operand.vmem [shape: bf16[2,16,64], index: 0, kind: input, shape index: {}]   ;;  %s755_s1 = inlined_call_operand.vmem [shape: bf16[192,128], index: 1, kind: input, shape index: {}]   ;;  %s756_s2 = inlined_call_operand.vmem [shape: f32[128,128], index: 2, kind: input, shape index: {}]   ;;  %s757_s3 = inlined_call_operand.vmem [shape: f32[2,128], index: 3, kind: input, shape index: {}]   ;;  %s758_s4 = inlined_call_operand.vmem [shape: f32[32,128], index: 4, kind: output, shape index: {}]  }
   0x1   :  { %v592_v0 = vld [vmem:[%s754_s0] sm:$0xf]  ;;  %v597_v1 = vld [vmem:[%s754_s0 + $0x8] sm:$0xf]  ;;  %261 = vmatprep.subr.bf16.mxu0 %v560_v2  ;;  %v26_v7 = vld [vmem:[%s754_s0 + $0x4] sm:$0xf] }
   0x2   :  { %58 = vrot.lane.b32.xlu0 %v592_v0, %s561_s19  ;;  %v31_v3 = vshrl.u32 %v592_v0, 16  ;;  %v34_v4 = vshll.u32 %v592_v0, 16  ;;  %113 = vrot.lane.b32.xlu1 %v597_v1, %s561_s19  ;;  %v90_v5 = vshrl.u32 %v597_v1, 16  ;;  %v93_v6 = vshll.u32 %v597_v1, 16  ;;  %v465_v9 = vld [vmem:[%s754_s0 + $0xc] sm:$0xf]  ;;  %vm625_vm2 = vmor %vm67_vm0, %vm68_vm1 }
   0x3   :  { %v39_v8 = vshrl.u32 %v26_v7, 16  ;;  %v42_v12 = vshll.u32 %v26_v7, 16  ;;  %v98_v15 = vshrl.u32 %v465_v9, 16  ;;  %v101_v16 = vshll.u32 %v465_v9, 16  ;;  %v540_v17 = vld [vmem:[%s755_s1 + $0x38] sm:$0xff]   ;;  %v541_v23 = vld [vmem:[%s755_s1 + $0x30] sm:$0xff]  }
   0x4   :  { %v70_v10 = vrot.slane %v31_v3, 4  ;;  %v71_v11 = vrot.slane %v34_v4, 5  ;;  %v121_v13 = vrot.slane %v90_v5, 4  ;;  %v122_v14 = vrot.slane %v93_v6, 5  ;;  %262 = vmatpush1.bf16.msra.mxu0 %v540_v17  ;;  %v542_v32 = vld [vmem:[%s755_s1 + $0x28] sm:$0xff]   ;;  %v543_v39 = vld [vmem:[%s755_s1 + $0x20] sm:$0xff]  }
   0x5   :  { %v33_v18 = vrot.slane %v31_v3, 7  ;;  %v92_v20 = vrot.slane %v90_v5, 7  ;;  %v41_v22 = vrot.slane %v39_v8, 7  ;;  %v74_v26 = vrot.slane %v42_v12, 5  ;;  %263 = vmatprep.subr.bf16.mxu0 %v560_v2  ;;  %v544_v47 = vld [vmem:[%s755_s1 + $0x18] sm:$0xff]   ;;  %v545_v52 = vld [vmem:[%s755_s1 + $0x10] sm:$0xff]  }
   0x6   :  { %v72_v19 = vor.u32 %v71_v11, %v70_v10  ;;  %60 = vrot.lane.b32.xlu0 %v26_v7, %s561_s19  ;;  %115 = vrot.lane.b32.xlu1 %v465_v9, %s561_s19  ;;  %v123_v21 = vor.u32 %v122_v14, %v121_v13  ;;  %v76_v27 = vrot.slane %v39_v8, 4  ;;  %v100_v30 = vrot.slane %v98_v15, 7  ;;  %v546_v58 = vld [vmem:[%s755_s1 + $0x8] sm:$0xff]   ;;  %v547_v59 = vld [vmem:[%s755_s1] sm:$0xff]  }
   0x7   :  { %v37_v24 = vrot.slane %v33_v18, 4  ;;  %v125_v31 = vrot.slane %v101_v16, 5  ;;  %v96_v33 = vrot.slane %v92_v20, 4  ;;  %v44_v34 = vor.u32 %v42_v12, %v41_v22  ;;  %v548_v60 = vld [vmem:[%s755_s1 + $0x58] sm:$0xff]   ;;  %v549_v61 = vld [vmem:[%s755_s1 + $0x50] sm:$0xff]   ;;  %v550_v62 = vld [vmem:[%s755_s1 + $0x48] sm:$0xff]  }
   0x8   :  { %v73_v25 = vrot.slane %v72_v19, 4  ;;  %v124_v28 = vrot.slane %v123_v21, 4  ;;  %264 = vmatpush1.bf16.msra.mxu0 %v541_v23  ;;  %v127_v36 = vrot.slane %v98_v15, 4  ;;  %v103_v37 = vor.u32 %v101_v16, %v100_v30  ;;  %v551_v63 = vld [vmem:[%s755_s1 + $0x40] sm:$0xff]   ;;  %v350_v9 = vld [vmem:[%s756_s2 + $0x78] sm:$0xff]  ;;  %v349_v10 = vld [vmem:[%s756_s2 + $0x70] sm:$0xff] }
   0x9   :  { %265 = vmatprep.subr.bf16.mxu0 %v560_v2  ;;  %vm18_vm3 = vcmask 1043456   ;;  %vm19_vm4 = vcmask 523268   ;;  %vm48_vm6 = vcmask 519168   ;;  %v77_v40 = vor.u32 %v76_v27, %v74_v26  ;;  %v348_v11 = vld [vmem:[%s756_s2 + $0x68] sm:$0xff]  ;;  %v347_v12 = vld [vmem:[%s756_s2 + $0x60] sm:$0xff]  ;;  %v346_v13 = vld [vmem:[%s756_s2 + $0x58] sm:$0xff] }
   0xa   :  { %v75_v35 = vsel %vm625_vm2, %v73_v25, %v74_v26  ;;  %v126_v38 = vsel %vm625_vm2, %v124_v28, %v125_v31  ;;  %vm20_vm5 = vmor %vm19_vm4, %vm18_vm3  ;;  %vm27_vm7 = vsmask.f32 256  ;;  %vm28_vm8 = vsmask.f32 4368  ;;  %v345_v14 = vld [vmem:[%s756_s2 + $0x50] sm:$0xff]  ;;  %v344_v15 = vld [vmem:[%s756_s2 + $0x48] sm:$0xff] }
   0xb   :  { %21 = vst.msk [vmem:[#allocation2] sm:$0xff] %vm20_vm5, %v560_v2  ;;  %22 = vst.msk [vmem:[#allocation2 + $0x8] sm:$0xff] %vm20_vm5, %v560_v2  ;;  %v128_v41 = vor.u32 %v127_v36, %v125_v31  ;;  %vm49_vm9 = vsmask.f32 7938  ;;  %v36_v44 = vor.u32 %v34_v4, %v33_v18  ;;  %v95_v45 = vor.u32 %v93_v6, %v92_v20  ;;  %v343_v16 = vld [vmem:[%s756_s2 + $0x40] sm:$0xff]  ;;  %v342_v17 = vld [vmem:[%s756_s2 + $0x38] sm:$0xff] }
   0xc   :  { %266 = vmatpush1.bf16.msra.mxu0 %v542_v32  ;;  %23 = vst.msk [vmem:[#allocation2 + $0x10] sm:$0xff] %vm20_vm5, %v560_v2  ;;  %24 = vst.msk [vmem:[#allocation2 + $0x18] sm:$0xff] %vm20_vm5, %v560_v2  ;;  %v78_v46 = vrot.slane %v77_v40, 4  ;;  %vm64_vm13 = vcmask 1043968   ;;  %vm254_vm14 = vcmask 523264   ;;  %v341_v18 = vld [vmem:[%s756_s2 + $0x30] sm:$0xff] }
   0xd   :  { %267 = vmatprep.subr.bf16.mxu0 %v560_v2  ;;  %81 = vst.msk [vmem:[#allocation2 + $0x4] sm:$0xf] %vm48_vm6, %v75_v35  ;;  %132 = vst.msk [vmem:[#allocation2 + $0x14] sm:$0xf] %vm48_vm6, %v126_v38  ;;  %v129_v48 = vrot.slane %v128_v41, 4  ;;  %v340_v19 = vld [vmem:[%s756_s2 + $0x28] sm:$0xff] }
   0xe   :  { %vm29_vm10 = vmor %vm27_vm7, %vm28_vm8  ;;  %v339_v20 = vld [vmem:[%s756_s2 + $0x20] sm:$0xff]  ;;  %v338_v21 = vld [vmem:[%s756_s2 + $0x18] sm:$0xff]  ;;  %vm563_vm15 = vmmov 0  }
   0xf   :  { %v45_v42 = vsel %vm29_vm10, %v37_v24, %v44_v34  ;;  %v104_v43 = vsel %vm29_vm10, %v96_v33, %v103_v37  ;;  %vm50_vm11 = vmand %vm48_vm6, %vm49_vm9  ;;  %v337_v22 = vld [vmem:[%s756_s2 + $0x10] sm:$0xff]  ;;  %v336_v23 = vld [vmem:[%s756_s2 + $0x8] sm:$0xff] }
  0x10   :  { %55 = vst.msk [vmem:[#allocation2 + $0x8] sm:$0xf] %vm48_vm6, %v45_v42  ;;  %110 = vst.msk [vmem:[#allocation2 + $0x18] sm:$0xf] %vm48_vm6, %v104_v43  ;;  %268 = vmatpush1.bf16.msra.mxu0 %v543_v39  ;;  %v335_v24 = vld [vmem:[%s756_s2] sm:$0xff] }
  0x11   :  { %269 = vmatprep.subr.bf16.mxu0 %v560_v2  ;;  %vm82_vm12 = vmand %vm48_vm6, %vm67_vm0 }
  0x12   :  { %v51_v49 = vld [vmem:[#allocation2] sm:$0xf]  ;;  %v83_v51 = vld [vmem:[#allocation2 + $0xc] sm:$0xf] }
  0x13   :  { %v107_v50 = vld [vmem:[#allocation2 + $0x10] sm:$0xf]  ;;  %v52_v53 = vsel %vm50_vm11, %v36_v44, %v51_v49  ;;  %v84_v55 = vsel %vm82_vm12, %v78_v46, %v83_v51  ;;  %v133_v56 = vld [vmem:[#allocation2 + $0x1c] sm:$0xf] }
  0x14   :  { %270 = vmatpush1.bf16.msra.mxu0 %v544_v47  ;;  %v108_v54 = vsel %vm50_vm11, %v95_v45, %v107_v50  ;;  %53 = vst [vmem:[#allocation2] sm:$0xf] %v52_v53  ;;  %85 = vst [vmem:[#allocation2 + $0xc] sm:$0xf] %v84_v55  ;;  %v134_v57 = vsel %vm82_vm12, %v129_v48, %v133_v56 }
  0x15   :  { %271 = vmatprep.subr.bf16.mxu0 %v560_v2  ;;  %109 = vst [vmem:[#allocation2 + $0x10] sm:$0xf] %v108_v54  ;;  %135 = vst [vmem:[#allocation2 + $0x1c] sm:$0xf] %v134_v57 }
  0x18   :  { %272 = vmatpush1.bf16.msra.mxu0 %v545_v52 }
  0x19   :  { %273 = vmatprep.subr.bf16.mxu0 %v560_v2 }
  0x1b   :  { %v554_v6 = vld [vmem:[#allocation2 + $0x4] ss:$8 sps:$4 sm:$0xff]  }
  0x1c   :  { %274 = vmatpush1.bf16.msra.mxu0 %v546_v58  ;;  %v555_v7 = vld [vmem:[#allocation2 + $0x14] ss:$8 sps:$4 sm:$0xff]   ;;  %482 = vmatprep.mubr.msk.bf16.mxu0 %vm254_vm14, %v554_v6  ;;  %v433_v6 = vld [vmem:[%s757_s3 + $0x1] sm:$0x1] }
  0x1d   :  { %275 = vmatprep.subr.bf16.mxu0 %v560_v2 }
  0x20   :  { %276 = vmatpush1.bf16.msra.mxu0 %v547_v59 }
  0x21   :  { %285 = vmatprep.subr.bf16.mxu0 %v560_v2 }
  0x24   :  { %286 = vmatpush2.bf16.msra.mxu0 %v548_v60 }
  0x25   :  { %287 = vmatprep.subr.bf16.mxu0 %v560_v2 }
  0x28   :  { %288 = vmatpush2.bf16.msra.mxu0 %v549_v61 }
  0x29   :  { %289 = vmatprep.subr.bf16.mxu0 %v560_v2 }
  0x2c   :  { %290 = vmatpush2.bf16.msra.mxu0 %v550_v62  ;;  %v436_v62 = vlaneseq }
  0x2d   :  { %291 = vmatprep.subr.bf16.mxu0 %v560_v2  ;;  %v562_v2 = vmov 0.0  }
  0x2e   :  { %501 = vmatprep.subr.mxu1 %v562_v2  ;;  %533 = vmatprep.mubr.msk.f32.mxu1 %vm563_vm15, %v562_v2 }
  0x2f   :  { %502 = vmatpush3.msra.mxu1 %v350_v9 }
  0x30   :  { %292 = vmatpush2.bf16.msra.mxu0 %v551_v63  ;;  %503 = vmatprep.subr.mxu1 %v562_v2  ;;  %v437_v63 = vshrl.u32 %v436_v62, 7 }
  0x31   :  { %504 = vmatpush3.msra.mxu1 %v349_v10 }
  0x32   :  { %505 = vmatprep.subr.mxu1 %v562_v2 }
  0x33   :  { %506 = vmatpush3.msra.mxu1 %v348_v11 }
  0x34   :  { %507 = vmatprep.subr.mxu1 %v562_v2 }
  0x35   :  { %508 = vmatpush3.msra.mxu1 %v347_v12 }
  0x36   :  { %509 = vmatprep.subr.mxu1 %v562_v2 }
  0x37   :  { %510 = vmatpush3.msra.mxu1 %v346_v13 }
  0x38   :  { %511 = vmatprep.subr.mxu1 %v562_v2 }
  0x39   :  { %512 = vmatpush3.msra.mxu1 %v345_v14 }
  0x3a   :  { %513 = vmatprep.subr.mxu1 %v562_v2 }
  0x3b   :  { %514 = vmatpush3.msra.mxu1 %v344_v15 }
  0x3c   :  { %515 = vmatprep.subr.mxu1 %v562_v2 }
  0x3d   :  { %516 = vmatpush3.msra.mxu1 %v343_v16 }
  0x3e   :  { %517 = vmatprep.subr.mxu1 %v562_v2 }
  0x3f   :  { %518 = vmatpush3.msra.mxu1 %v342_v17 }
  0x40   :  { %519 = vmatprep.subr.mxu1 %v562_v2 }
  0x41   :  { %520 = vmatpush3.msra.mxu1 %v341_v18 }
  0x42   :  { %521 = vmatprep.subr.mxu1 %v562_v2 }
  0x43   :  { %522 = vmatpush3.msra.mxu1 %v340_v19 }
  0x44   :  { %523 = vmatprep.subr.mxu1 %v562_v2 }
  0x45   :  { %524 = vmatpush3.msra.mxu1 %v339_v20 }
  0x46   :  { %525 = vmatprep.subr.mxu1 %v562_v2 }
  0x47   :  { %526 = vmatpush3.msra.mxu1 %v338_v21 }
  0x48   :  { %527 = vmatprep.subr.mxu1 %v562_v2 }
  0x49   :  { %528 = vmatpush3.msra.mxu1 %v337_v22 }
  0x4a   :  { %529 = vmatprep.subr.mxu1 %v562_v2 }
  0x4b   :  { %530 = vmatpush3.msra.mxu1 %v336_v23 }
  0x4c   :  { %531 = vmatprep.subr.mxu1 %v562_v2 }
  0x4d   :  { %532 = vmatpush3.msra.mxu1 %v335_v24 }
  0x74   :  { %v59_v0 = vpop.permute.xlu0 %58  ;;  %v114_v1 = vpop.permute.xlu1 %113 }
  0x75   :  { %65 = vst.msk [vmem:[#allocation2] sm:$0xf] %vm64_vm13, %v59_v0  ;;  %119 = vst.msk [vmem:[#allocation2 + $0x10] sm:$0xf] %vm64_vm13, %v114_v1  ;;  %v426_v1 = vld [vmem:[%s757_s3] sm:$0x1] }
  0x78   :  { %v61_v3 = vpop.permute.xlu0 %60  ;;  %v116_v4 = vpop.permute.xlu1 %115 }
  0x79   :  { %66 = vst.msk [vmem:[#allocation2 + $0x8] sm:$0xf] %vm64_vm13, %v61_v3  ;;  %120 = vst.msk [vmem:[#allocation2 + $0x18] sm:$0xf] %vm64_vm13, %v116_v4  ;;  %v438_v4 = vsub.s32 0, %v437_v63 }
  0x80   :  { %v552_v5 = vld [vmem:[#allocation2] ss:$8 sps:$4 sm:$0xff]   ;;  %v557_v8 = vld [vmem:[#allocation2 + $0x10] ss:$8 sps:$4 sm:$0xff]  }
  0x81   :  { %294 = vmatmul.mubr.bf16.vlgmr.msra.gmra.mxu0 %v552_v5 }
  0x82   :  { %483 = vmatprep.mubr.msk.bf16.mxu0 %vm254_vm14, %v555_v7 }
  0x89   :  { %302 = vmatmul.mubr.bf16.gmra.mxu0 %v557_v8 }
 0x141   :  { %v295_v25 = vpop.f32.mrf.mxu0 }
 0x142   :  { %v320_v31 = vmul.f32 %v295_v25, %v295_v25 }
 0x143   :  { %v297_v26 = vpop.f32.mrf.mxu0 }
 0x145   :  { %v298_v27 = vpop.f32.mrf.mxu0 }
 0x146   :  { %v321_v29 = vmul.f32 %v298_v27, %v298_v27  ;;  %v310_v32 = vadd.f32 %v298_v27, %v295_v25 }
 0x147   :  { %v300_v28 = vpop.f32.mrf.mxu0 }
 0x148   :  { %v324_v35 = vadd.f32 %v321_v29, %v320_v31 }
 0x149   :  { %v303_v30 = vpop.f32.mrf.mxu0 }
 0x14a   :  { %v322_v33 = vmul.f32 %v303_v30, %v303_v30  ;;  %v311_v36 = vadd.f32 %v310_v32, %v303_v30 }
 0x14b   :  { %v305_v34 = vpop.f32.mrf.mxu0 }
 0x14c   :  { %v325_v38 = vadd.f32 %v324_v35, %v322_v33 }
 0x14d   :  { %v306_v37 = vpop.f32.mrf.mxu0 }
 0x14e   :  { %v312_v39 = vadd.f32 %v311_v36, %v306_v37  ;;  %v323_v40 = vmul.f32 %v306_v37, %v306_v37 }
 0x14f   :  { %v308_v41 = vpop.f32.mrf.mxu0 }
 0x150   :  { %v313_v42 = vrot.slane %v312_v39, 4  ;;  %v326_v43 = vadd.f32 %v325_v38, %v323_v40 }
 0x152   :  { %v314_v44 = vadd.f32 %v313_v42, %v312_v39  ;;  %v327_v45 = vrot.slane %v326_v43, 4 }
 0x154   :  { %v315_v46 = vrot.slane %v314_v44, 2  ;;  %v328_v47 = vadd.f32 %v327_v45, %v326_v43 }
 0x156   :  { %v316_v48 = vadd.f32 %v315_v46, %v314_v44  ;;  %v329_v49 = vrot.slane %v328_v47, 2 }
 0x158   :  { %v317_v50 = vrot.slane %v316_v48, 1  ;;  %v330_v51 = vadd.f32 %v329_v49, %v328_v47 }
 0x15a   :  { %v318_v52 = vadd.f32 %v317_v50, %v316_v48  ;;  %v331_v53 = vrot.slane %v330_v51, 1 }
 0x15c   :  { %319 = vst [vmem:[#allocation3] sm:$0x1] %v318_v52  ;;  %v332_v54 = vadd.f32 %v331_v53, %v330_v51 }
 0x15e   :  { %333 = vst [vmem:[#allocation3 + $0x1] sm:$0x1] %v332_v54 }
 0x165   :  { %v334_v55 = vld [vmem:[#allocation3] sm:$0x3] }
 0x166   :  { %534 = vmatmul.mubr.f32.vlgmr.msra.gmra.mxu1 %v334_v55 }
 0x226   :  { %v417_v56 = vpop.f32.mrf.mxu1 }
 0x227   :  { %v421_v57 = vmul.f32 %v417_v56, %v417_v56 }
 0x228   :  { %v535_v58 = vpop.f32.mrf.mxu1 }
 0x229   :  { %v423_v59 = vrot.slane %v421_v57, 7 }
 0x22b   :  { %v425_v60 = vsub.f32 %v417_v56, %v423_v59 }
 0x22d   :  { %v427_v61 = vadd.f32 1e-05, %v425_v60 }
 0x22f   :  { %558 = vrsqrt.f32 %v427_v61 }
 0x23c   :  { %v559_v0 = vpop.eup %558 }
 0x23d   :  { %v430_v3 = vrot.slane %v559_v0, 1 }
 0x23f   :  { %v432_v5 = vmul.f32 %v430_v3, %v426_v1 }
 0x241   :  { %v434_v7 = vmul.f32 %v432_v5, %v417_v56  ;;  %v439_v8 = vrot.slane %v432_v5, %v438_v4 }
 0x243   :  { %v435_v2 = vsub.f32 %v433_v6, %v434_v7  ;;  %v440_v9 = vmul.f32 %v439_v8, %v295_v25  ;;  %v441_v10 = vmul.f32 %v439_v8, %v298_v27  ;;  %v442_v11 = vmul.f32 %v439_v8, %v303_v30 }
 0x244   :  { %v443_v12 = vmul.f32 %v439_v8, %v306_v37 }
 0x245   :  { %v447_v13 = vrot.slane %v435_v2, %v438_v4 }
 0x247   :  { %v448_v14 = vadd.f32 %v447_v13, %v440_v9  ;;  %v449_v15 = vadd.f32 %v447_v13, %v441_v10  ;;  %v450_v16 = vadd.f32 %v447_v13, %v442_v11  ;;  %v451_v17 = vadd.f32 %v447_v13, %v443_v12 }
 0x249   :  { %v452_v18 = vmax.f32 %v448_v14, 0.0  ;;  %v453_v19 = vmax.f32 %v449_v15, 0.0  ;;  %v454_v20 = vmax.f32 %v450_v16, 0.0  ;;  %v455_v21 = vmax.f32 %v451_v17, 0.0 }
 0x24b   :  { %456 = vst [vmem:[%s758_s4] sm:$0xff] %v452_v18  ;;  %457 = vst [vmem:[%s758_s4 + $0x8] sm:$0xff] %v453_v19 }
 0x24c   :  { %458 = vst [vmem:[%s758_s4 + $0x10] sm:$0xff] %v454_v20  ;;  %459 = vst [vmem:[%s758_s4 + $0x18] sm:$0xff] %v455_v21 }

</bundles_post_ra>
